<compile_context>
chip_gen: v5e
topology: v5e:2x2
jax: 0.10.0
libtpu: 0.0.40
codegen_flags: <defaults>
</compile_context>

<pallas_src>
import jax
import jax.numpy as jnp
from jax import lax
from jax.experimental import pallas as pl
from jax.experimental.pallas import tpu as pltpu

EPS = 1e-5


def _layernorm_kernel(x_ref, gamma_ref, beta_ref, o_ref):
    # x_ref: (TB, N) -- each row is one batch element's flattened (S, D) slab.
    # gamma_ref / beta_ref: (1, N) affine params (resident across grid steps).
    x = x_ref[...].astype(jnp.float32)
    inv_n = 1.0 / x.shape[-1]

    # Pass 1: mean.
    mean = jnp.sum(x, axis=-1, keepdims=True) * inv_n          # (TB, 1)
    # Pass 2 (VMEM-resident, essentially free in the HBM-bound regime):
    # centered variance -- no E[x^2]-mean^2 cancellation.
    xc = x - mean                                              # (TB, N)
    var = jnp.sum(xc * xc, axis=-1, keepdims=True) * inv_n     # (TB, 1)
    inv_std = lax.rsqrt(var + EPS)                             # (TB, 1)

    gamma = gamma_ref[...].astype(jnp.float32)                 # (1, N)
    beta = beta_ref[...].astype(jnp.float32)                   # (1, N)

    # Fused normalize + affine.  Broadcasts are (TB,1)x(TB,N) and (1,N)x(TB,N)
    # -- no block-sized inv_std*gamma outer-product temporary.
    o_ref[...] = ((xc * inv_std) * gamma + beta).astype(o_ref.dtype)


def _num_cores():
    """2 TensorCores per chip on v7x, 1 on v5e/v6e."""
    try:
        kind = jax.devices()[0].device_kind.lower()
    except Exception:
        kind = ""
    return 2 if "v7" in kind else 1


def _grid_semantics(n_cores):
    # CORE_PARALLEL actually changes codegen (shards the grid axis across
    # TensorCores on v7x); plain "parallel" elsewhere.
    if n_cores > 1:
        return (pltpu.CORE_PARALLEL,)
    return ("parallel",)


def _pick_block_rows(batch, row_bytes, n_cores):
    """Rows per block: ~4 MiB per input block, multiple of 8 (or full batch)."""
    target = 4 * 1024 * 1024
    tb = max(1, target // max(1, row_bytes))
    tb = (tb // 8) * 8

    if tb < 8:
        # A single row exceeds the block target: clamp to the (8,128) minimum
        # tile height instead of falling back to the full batch (which could
        # blow VMEM for large S*D).
        # TODO(synk): add an N-tiled path (second 'arbitrary' grid axis with a
        # row accumulator) for normalized dims too large for even 8 rows.
        return batch if batch <= 8 else 8

    # Keep at least 2 grid steps per core (megacore occupancy on v7x +
    # something for the pipeline to overlap) when the batch allows it.
    min_steps = 2 * n_cores
    if batch >= min_steps * 8:
        cap = max(8, ((batch // min_steps) // 8) * 8)
        tb = min(tb, cap)

    if tb >= batch:
        return batch
    return tb


def _vmem_limit_bytes(tb, n, in_itemsize, out_itemsize):
    """Size the scoped VMEM limit from the real footprint (+slack)."""
    block = tb * n
    # 2x double-buffered input + output blocks, ~3 block-sized f32
    # temporaries (f32 cast, centered, normalized), resident gamma/beta.
    need = block * (2 * in_itemsize + 2 * out_itemsize + 3 * 4) + 4 * n * 4
    need = int(need * 1.25) + (2 << 20)      # 25% + 2 MiB slack
    return max(16 << 20, min(need, 56 << 20))  # stay under v7x's 64 MiB


def layer_norm(x, gamma, beta):
    """x: (B, S, D); gamma, beta: (S, D). LayerNorm over (S, D) per batch elem."""
    B, S, D = x.shape
    N = S * D

    # Flatten normalized axes -> lane-dense last dim.
    x2 = x.reshape(B, N)
    g2 = gamma.reshape(1, N)
    b2 = beta.reshape(1, N)

    n_cores = _num_cores()
    tb = _pick_block_rows(B, N * x.dtype.itemsize, n_cores)
    grid = (pl.cdiv(B, tb),)

    cost = pl.CostEstimate(
        flops=9 * B * N,
        transcendentals=B,
        bytes_accessed=2 * B * N * x.dtype.itemsize + 2 * N * gamma.dtype.itemsize,
    )

    out = pl.pallas_call(
        _layernorm_kernel,
        out_shape=jax.ShapeDtypeStruct((B, N), x.dtype),
        grid_spec=pltpu.PrefetchScalarGridSpec(
            num_scalar_prefetch=0,
            grid=grid,
            in_specs=[
                pl.BlockSpec((tb, N), lambda i: (i, 0)),
                pl.BlockSpec((1, N), lambda i: (0, 0)),
                pl.BlockSpec((1, N), lambda i: (0, 0)),
            ],
            out_specs=pl.BlockSpec((tb, N), lambda i: (i, 0)),
        ),
        compiler_params=pltpu.CompilerParams(
            dimension_semantics=_grid_semantics(n_cores),
            vmem_limit_bytes=_vmem_limit_bytes(
                tb, N, x.dtype.itemsize, x.dtype.itemsize
            ),
        ),
        cost_estimate=cost,
    )(x2, g2, b2)
    return out.reshape(B, S, D)


def layer_norm_ref(x, gamma, beta):
    xf = x.astype(jnp.float32)
    mean = jnp.mean(xf, axis=(1, 2), keepdims=True)
    var = jnp.mean((xf - mean) ** 2, axis=(1, 2), keepdims=True)
    y = (xf - mean) * lax.rsqrt(var + EPS)
    return (y * gamma[None] + beta[None]).astype(x.dtype)


if __name__ == "__main__":
    B, S, D = 2, 8, 32  # batch, seq_len, d_model

    key = jax.random.PRNGKey(0)
    kx, kg, kb = jax.random.split(key, 3)

    x = jax.random.normal(kx, (B, S, D), dtype=jnp.float32)
    # nn.LayerNorm defaults are ones/zeros; perturb deterministically so the
    # affine path is exercised.
    gamma = jnp.ones((S, D), jnp.float32) + 0.1 * jax.random.normal(kg, (S, D), jnp.float32)
    beta = 0.1 * jax.random.normal(kb, (S, D), jnp.float32)

    out = jax.block_until_ready(layer_norm(x, gamma, beta))

    ref = layer_norm_ref(x, gamma, beta)
    assert out.shape == (B, S, D)
    assert jnp.allclose(out, ref, atol=1e-4, rtol=1e-4), "mismatch vs reference"

    print("KERNEL_OK")
</pallas_src>

<mosaic_0001>
module attributes {stable_mosaic.version = 11 : i64} {
  func.func @_layernorm_kernel(%arg0: i32, %arg1: memref<2x256xf32, #tpu.memory_space<vmem>>, %arg2: memref<1x256xf32, #tpu.memory_space<vmem>>, %arg3: memref<1x256xf32, #tpu.memory_space<vmem>>, %arg4: memref<2x256xf32, #tpu.memory_space<vmem>>) attributes {dimension_semantics = [#tpu.dimension_semantics<parallel>], iteration_bounds = array<i64: 1>, scalar_prefetch = 0 : i64, scratch_operands = 0 : i64, tpu.core_type = #tpu.core_type<tc>, window_params = [{transform_indices = @transform_0, window_bounds = array<i64: 2, 256>}, {pipeline_mode = #tpu.pipeline_mode<synchronous>, transform_indices = @transform_1, window_bounds = array<i64: 1, 256>}, {pipeline_mode = #tpu.pipeline_mode<synchronous>, transform_indices = @transform_2, window_bounds = array<i64: 1, 256>}, {transform_indices = @transform_3, window_bounds = array<i64: 2, 256>}]} {
    %c0 = arith.constant 0 : index
    %c0_0 = arith.constant 0 : index
    %0 = vector.load %arg1[%c0, %c0_0] : memref<2x256xf32, #tpu.memory_space<vmem>>, vector<2x256xf32>
    %cst = arith.constant dense<0.000000e+00> : vector<2xf32>
    %1 = vector.multi_reduction <add>, %0, %cst [1] : vector<2x256xf32> to vector<2xf32>
    %2 = vector.shape_cast %1 : vector<2xf32> to vector<2x1xf32>
    %cst_1 = arith.constant 3.906250e-03 : f32
    %3 = vector.broadcast %cst_1 : f32 to vector<2x1xf32>
    %4 = arith.mulf %2, %3 : vector<2x1xf32>
    %5 = vector.broadcast %4 : vector<2x1xf32> to vector<2x256xf32>
    %6 = arith.subf %0, %5 : vector<2x256xf32>
    %7 = arith.mulf %6, %6 : vector<2x256xf32>
    %cst_2 = arith.constant dense<0.000000e+00> : vector<2xf32>
    %8 = vector.multi_reduction <add>, %7, %cst_2 [1] : vector<2x256xf32> to vector<2xf32>
    %9 = vector.shape_cast %8 : vector<2xf32> to vector<2x1xf32>
    %cst_3 = arith.constant 3.906250e-03 : f32
    %10 = vector.broadcast %cst_3 : f32 to vector<2x1xf32>
    %11 = arith.mulf %9, %10 : vector<2x1xf32>
    %cst_4 = arith.constant 9.99999974E-6 : f32
    %12 = vector.broadcast %cst_4 : f32 to vector<2x1xf32>
    %13 = arith.addf %11, %12 : vector<2x1xf32>
    %14 = math.rsqrt %13 : vector<2x1xf32>
    %c0_5 = arith.constant 0 : index
    %c0_6 = arith.constant 0 : index
    %15 = vector.load %arg2[%c0_5, %c0_6] : memref<1x256xf32, #tpu.memory_space<vmem>>, vector<1x256xf32>
    %c0_7 = arith.constant 0 : index
    %c0_8 = arith.constant 0 : index
    %16 = vector.load %arg3[%c0_7, %c0_8] : memref<1x256xf32, #tpu.memory_space<vmem>>, vector<1x256xf32>
    %17 = vector.broadcast %14 : vector<2x1xf32> to vector<2x256xf32>
    %18 = arith.mulf %6, %17 : vector<2x256xf32>
    %19 = vector.broadcast %15 : vector<1x256xf32> to vector<2x256xf32>
    %20 = arith.mulf %18, %19 : vector<2x256xf32>
    %21 = vector.broadcast %16 : vector<1x256xf32> to vector<2x256xf32>
    %22 = arith.addf %20, %21 : vector<2x256xf32>
    %c0_9 = arith.constant 0 : index
    %c0_10 = arith.constant 0 : index
    %23 = vector.load %arg4[%c0_9, %c0_10] : memref<2x256xf32, #tpu.memory_space<vmem>>, vector<2x256xf32>
    tpu.vector_store %arg4[%c0_9, %c0_10], %22 {strides = array<i32>} : memref<2x256xf32, #tpu.memory_space<vmem>>, vector<2x256xf32>,
    return
  }
  func.func @transform_0(%arg0: i32) -> (i32, i32) {
    %c0_i32 = arith.constant 0 : i32
    %c0_i32_0 = arith.constant 0 : i32
    return %arg0, %c0_i32 : i32, i32
  }
  func.func @transform_1(%arg0: i32) -> (i32, i32) {
    %c0_i32 = arith.constant 0 : i32
    %c0_i32_0 = arith.constant 0 : i32
    %c0_i32_1 = arith.constant 0 : i32
    return %c0_i32, %c0_i32_0 : i32, i32
  }
  func.func @transform_2(%arg0: i32) -> (i32, i32) {
    %c0_i32 = arith.constant 0 : i32
    %c0_i32_0 = arith.constant 0 : i32
    %c0_i32_1 = arith.constant 0 : i32
    return %c0_i32, %c0_i32_0 : i32, i32
  }
  func.func @transform_3(%arg0: i32) -> (i32, i32) {
    %c0_i32 = arith.constant 0 : i32
    %c0_i32_0 = arith.constant 0 : i32
    return %arg0, %c0_i32 : i32, i32
  }
}

</mosaic_0001>

<bundles_post_ra>
// kernel: tpu_custom_call.1
= control target key start
LH: loop header
LB: loop body
LE: loop exit
PB: predicated region body
PF: predicated region fallthrough
CT: control target
= control target key end

     0   :  { %8 = vsyncpa [#allocation3], 0  ;;  %s295_s0 = inlined_call_operand.hbm [shape: f32[2,256], index: 0, kind: input, shape index: {}]   ;;  %s296_s1 = inlined_call_operand.hbm [shape: f32[1,256], index: 1, kind: input, shape index: {}]   ;;  %s297_s2 = inlined_call_operand.hbm [shape: f32[1,256], index: 2, kind: input, shape index: {}]   ;;  %s298_s3 = inlined_call_operand.hbm [shape: f32[2,256], index: 3, kind: output, shape index: {}]  }
   0x1   :  { %9 = vsyncpa [#allocation6], 0  ;;  %s27_s14 = sshll.u32 %s296_s1, 4  ;;  %s28_s14 = int_to_ptr.hbm [resolvable:$true] %s27_s14 }
   0x2   :  { %10 = vsyncpa [#allocation4], 0  ;;  %s252_s15 = smov [#allocation5]   ;;  %s16_s19 = sshll.u32 %s295_s0, 4  ;;  %s17_s19 = int_to_ptr.hbm [resolvable:$true] %s16_s19 }
   0x3   :  { %s29_s16 = sshll.u32 %s252_s15, 4  ;;  %s253_s20 = smov [#allocation2]   ;;  %s30_s16 = int_to_ptr.vmem [resolvable:$true] %s29_s16 }
   0x4   :  { %32 = dma.hbm_to_vmem [thread:$0]  %s28_s14, 32, %s30_s16, [#allocation6]  }
   0x5   :  { %s18_s21 = sshll.u32 %s253_s20, 4  ;;  %s38_s24 = sshll.u32 %s297_s2, 4  ;;  %s19_s21 = int_to_ptr.vmem [resolvable:$true] %s18_s21  ;;  %s39_s24 = int_to_ptr.hbm [resolvable:$true] %s38_s24 }
   0x6   :  { %21 = dma.hbm_to_vmem [thread:$0]  %s17_s19, 64, %s19_s21, [#allocation3]  }
   0x7   :  { %s254_s1 = smov [#allocation7]  }
   0x8   :  { %s40_s25 = sshll.u32 %s254_s1, 4  ;;  %s41_s25 = int_to_ptr.vmem [resolvable:$true] %s40_s25 }
   0x9   :  { %43 = dma.hbm_to_vmem [thread:$0]  %s39_s24, 32, %s41_s25, [#allocation6]  }
   0xa   :  { %246 = dma.done.wait [#allocation3], 64  }
   0xb   :  { %247 = vsyncadd [#allocation3], 4294967232 }
   0xc   :  { %248 = dma.done.wait [#allocation6], 64  }
   0xd   :  { %249 = vsyncadd [#allocation6], 4294967232  ;;  %v56_v0 = vld [vmem:[#allocation2] sm:$0xf]  ;;  %vm63_vm0 = vcmask 1041408   ;;  %s256_s0 = smov [#allocation8]  }
   0xe   :  { %58 = vst [vmem:[#allocation1] ss:$4 sm:$0xff] %v56_v0  ;;  %v255_v6 = vmov 269488144   ;;  %v101_v24 = vld [vmem:[#allocation5] sm:$0x3] }
   0xf   :  { %v72_v7 = vunpack.c.l.s4 %v255_v6  ;;  %v102_v26 = vld [vmem:[#allocation7] sm:$0x3]  ;;  %v112_v28 = vperm.slane %v101_v24, 1  ;;  %v111_v32 = vperm.slane %v101_v24, 0  ;;  %s130_s2 = sshll.u32 %s256_s0, 4  ;;  %s132_s28 = sshll.u32 %s298_s3, 4  ;;  %s131_s2 = int_to_ptr.vmem [resolvable:$true] %s130_s2  ;;  %s133_s28 = int_to_ptr.hbm [resolvable:$true] %s132_s28 }
  0x10   :  { %v119_v30 = vperm.slane %v102_v26, 1  ;;  %v118_v35 = vperm.slane %v102_v26, 0 }
  0x11   :  { %v73_v8 = vunpack.c.0.s8 %v72_v7  ;;  %v113_v33 = vrot.slane %v112_v28, 6 }
  0x12   :  { %v120_v36 = vrot.slane %v119_v30, 6 }
  0x13   :  { %v114_v38 = vsel %vm63_vm0, %v111_v32, %v113_v33 }
  0x14   :  { %v121_v40 = vsel %vm63_vm0, %v118_v35, %v120_v36 }
  0x15   :  { %v59_v1 = vld.sshfl [vmem:[#allocation1] sm:$0xff pattern:$0x73625140]  ;;  %v60_v2 = vld.sshfl [vmem:[#allocation1 + $0x8] sm:$0xff pattern:$0x73625140] }
  0x16   :  { %v64_v3 = vsel %vm63_vm0, %v59_v1, 0.0  ;;  %v65_v4 = vsel %vm63_vm0, %v60_v2, 0.0 }
  0x17   :  { %v66_v5 = vadd.f32 %v65_v4, %v64_v3 }
  0x19   :  { %67 = vadd.xlane.f32.xlu0 %v66_v5 }
  0x8c   :  { %v68_v9 = vpop.xlane.xlu0 %67 }
  0x8d   :  { %v69_v10 = vmul.f32 0.00390625, %v68_v9 }
  0x8f   :  { %v74_v11 = vperm.slane %v69_v10, %v73_v8 }
  0x91   :  { %v76_v12 = vsub.f32 %v56_v0, %v74_v11 }
  0x93   :  { %v77_v13 = vmul.f32 %v76_v12, %v76_v12 }
  0x95   :  { %79 = vst [vmem:[#allocation1] ss:$4 sm:$0xff] %v77_v13 }
  0x9c   :  { %v80_v14 = vld.sshfl [vmem:[#allocation1] sm:$0xff pattern:$0x73625140]  ;;  %v81_v15 = vld.sshfl [vmem:[#allocation1 + $0x8] sm:$0xff pattern:$0x73625140] }
  0x9d   :  { %v84_v16 = vsel %vm63_vm0, %v80_v14, 0.0  ;;  %v85_v17 = vsel %vm63_vm0, %v81_v15, 0.0 }
  0x9e   :  { %v86_v18 = vadd.f32 %v85_v17, %v84_v16 }
  0xa0   :  { %87 = vadd.xlane.f32.xlu0 %v86_v18 }
 0x113   :  { %v88_v19 = vpop.xlane.xlu0 %87 }
 0x114   :  { %v89_v20 = vmul.f32 0.00390625, %v88_v19 }
 0x116   :  { %v90_v21 = vadd.f32 1e-05, %v89_v20 }
 0x118   :  { %148 = vrsqrt.f32 %v90_v21  ;;  %vm97_vm2 = vweird.f32 %v90_v21 }
 0x11e   :  { %v149_v22 = vpop.eup %148 }
 0x11f   :  { %v92_v23 = vmul.f32 %v149_v22, %v90_v21  ;;  %vm98_vm1 = vweird.f32 %v149_v22 }
 0x120   :  { %vm99_vm3 = vmor %vm97_vm2, %vm98_vm1 }
 0x121   :  { %v93_v25 = vmul.f32 %v149_v22, %v92_v23 }
 0x123   :  { %v94_v27 = vmul.f32 0.5, %v93_v25 }
 0x125   :  { %v95_v29 = vsub.f32 1.5, %v94_v27 }
 0x127   :  { %v96_v31 = vmul.f32 %v149_v22, %v95_v29 }
 0x129   :  { %v100_v34 = vsel %vm99_vm3, %v149_v22, %v96_v31 }
 0x12a   :  { %v107_v37 = vperm.slane %v100_v34, %v73_v8 }
 0x12c   :  { %v109_v39 = vmul.f32 %v107_v37, %v76_v12 }
 0x12e   :  { %v116_v41 = vmul.f32 %v114_v38, %v109_v39 }
 0x130   :  { %v123_v42 = vadd.f32 %v121_v40, %v116_v41 }
 0x132   :  { %124 = vst [vmem:[#allocation8] sm:$0xf] %v123_v42 }
 0x133   :  { %135 = dma.vmem_to_hbm [thread:$0]  %s131_s2, 64, %s133_s28, [#allocation4]  }
 0x134   :  { %250 = dma.done.wait [#allocation4], 64  }
 0x135   :  { %251 = vsyncadd [#allocation4], 4294967232 }
 0x136   :  { %140 = vsyncpa [#allocation3], 1 }
 0x137   :  { %141 = vsyncpa [#allocation6], 1 }
 0x138   :  { %142 = vsyncpa [#allocation4], 1 }

</bundles_post_ra>
